<compile_context>
chip_gen: v5e
topology: v5e:2x2
jax: 0.10.0
libtpu: 0.0.40
codegen_flags: <defaults>
</compile_context>

<pallas_src>
import functools

import jax
import jax.numpy as jnp
from jax import lax
from jax.experimental import pallas as pl
from jax.experimental.pallas import tpu as pltpu


def _round_up(x, m):
    return (x + m - 1) // m * m


def _pick_tq(n_t, n_g):
    # Cap tq so the (tq, n_g) f32 attention temporaries stay ~<= 4 MiB,
    # but keep tq >= 64 (>=256 preferred on v6e/v7x when it fits).
    cap = max(64, min(512, (1 << 20) // max(n_g, 1)))
    for cand in (512, 256, 128, 64, 32, 16, 8):
        if cand <= cap and n_t % cand == 0:
            return cand
    return n_t


def _pick_tg(n_g):
    for cand in (1024, 512, 256, 128, 64, 32, 16, 8):
        if n_g % cand == 0:
            return cand
    return n_g


@functools.lru_cache()
def _use_bf16_exp():
    # bf16 EUP exp only on v6e/v7x (v5e and older have no bf16 EUP/VPU).
    try:
        kind = jax.devices()[0].device_kind.lower()
        return ("v6" in kind) or ("v7" in kind) or ("7x" in kind)
    except Exception:
        return False


@functools.lru_cache()
def _vmem_limit_bytes():
    # 48 MiB on 128 MiB-VMEM parts (v5e/v6e); <=40 MiB on 64 MiB parts (v7x).
    try:
        cap = pltpu.get_tpu_info().vmem_capacity_bytes
        if cap <= 64 * 1024 * 1024:
            return 40 * 1024 * 1024
    except Exception:
        pass
    return 48 * 1024 * 1024


# --------------------------------------------------------------------------
# Pass 1: phi(event) / g(event) 1x1 convs + 2x2 max-pool.
# Grid = (B, G), G = N_g // tg.
#   evt_ref : (1, 4, tg, Cp) bf16   4 window-offset views of pooled event
#   wpg_ref : (Cp, 2*ICp)    bf16   [w_phi | w_g] concatenated (one MXU RHS)
#   bpg_ref : (1, 2*ICp)     f32    [b_phi | b_g]
#   out     : (1, tg, 2*ICp) bf16   [phi | g]
# --------------------------------------------------------------------------
def phig_kernel(evt_ref, wpg_ref, bpg_ref, phig_ref):
    w = wpg_ref[...]
    acc = jnp.dot(evt_ref[0, 0], w, preferred_element_type=jnp.float32)
    for k in range(1, 4):                       # max over the 2x2 pool window
        acc = jnp.maximum(
            acc, jnp.dot(evt_ref[0, k], w, preferred_element_type=jnp.float32))
    # per-channel bias commutes with the max-pool: add once after pooling
    phig_ref[0] = (acc + bpg_ref[...]).astype(phig_ref.dtype)


# --------------------------------------------------------------------------
# Pass 2: attention + W projection (BN folded) + residual.
# Grid = (B, Q), Q = N_t // tq.  No scratch, no cross-iteration state.
#   rgb_ref  : (1, tq, Cp)        bf16
#   phig_ref : (1, N_g, 2*ICp)    bf16   per-batch resident [phi | g]
#   wth/bth  : (Cp, ICp)/(1, ICp)        theta 1x1 conv
#   wW/bW    : (ICp, Cp)/(1, Cp)         W 1x1 conv with BatchNorm folded in
#   out_ref  : (1, tq, Cp)        bf16
# --------------------------------------------------------------------------
def ldam_kernel(rgb_ref, phig_ref, wth_ref, bth_ref, wW_ref, bW_ref, out_ref,
                *, use_bf16_exp):
    icp = wth_ref.shape[1]
    rgb = rgb_ref[0]                                               # (tq, Cp) bf16

    # theta(rgb): 1x1 conv as bf16 MXU matmul, f32 accumulation
    theta = jnp.dot(rgb, wth_ref[...],
                    preferred_element_type=jnp.float32) + bth_ref[...]  # (tq, ICp)

    phi = phig_ref[0, :, :icp]                                     # (N_g, ICp) bf16
    g = phig_ref[0, :, icp:]                                       # (N_g, ICp) bf16

    # f = theta @ phi^T (contract over inter channels; no feeding transpose)
    f = lax.dot_general(theta.astype(jnp.bfloat16), phi,
                        dimension_numbers=(((1,), (1,)), ((), ())),
                        preferred_element_type=jnp.float32)        # (tq, N_g)

    # softmax over keys; normalization deferred past the p @ g matmul so the
    # scaling is tq*ICp multiplies instead of tq*N_g.
    f = f - jnp.max(f, axis=-1, keepdims=True)
    if use_bf16_exp:
        p = jnp.exp(f.astype(jnp.bfloat16))                        # bf16 EUP exp
        s = jnp.sum(p, axis=-1, keepdims=True, dtype=jnp.float32)  # f32 denominator
    else:
        pf = jnp.exp(f)
        s = jnp.sum(pf, axis=-1, keepdims=True)
        p = pf.astype(jnp.bfloat16)

    y = jnp.dot(p, g, preferred_element_type=jnp.float32)          # (tq, ICp)
    y = y * pl.reciprocal(s, approx=True)                          # deferred norm

    # W(y): 1x1 conv back to in_channels (BatchNorm pre-folded) + residual
    wy = jnp.dot(y.astype(jnp.bfloat16), wW_ref[...],
                 preferred_element_type=jnp.float32) + bW_ref[...]  # (tq, Cp)
    out_ref[0] = (wy + rgb.astype(jnp.float32)).astype(out_ref.dtype)


# --------------------------------------------------------------------------
# Host-side glue (jitted: pool / transpose / pad / upsample fuse under XLA).
# --------------------------------------------------------------------------
def _maxpool2_nchw(x):
    B, C, H, W = x.shape
    return x.reshape(B, C, H // 2, 2, W // 2, 2).max(axis=(3, 5))


@functools.partial(jax.jit, static_argnames=("tq", "tg"))
def ldam_forward(rgb, event, params, *, tq=None, tg=None):
    """rgb, event: (B, C, H, W) float32 (NCHW). Returns (B, C, H, W) float32."""
    B, C, H, W = rgb.shape
    IC = params["w_theta"].shape[0]
    if H % 4 != 0 or W % 4 != 0:
        raise ValueError("LDAM kernel requires H and W to be multiples of 4")
    H2, W2, H4, W4 = H // 2, W // 2, H // 4, W // 4
    N_t, N_g = H2 * W2, H4 * W4

    # pad channel dims to lane-dense multiples of 128
    Cp = max(128, _round_up(C, 128))
    ICp = max(128, _round_up(IC, 128))

    if tq is None:
        tq = _pick_tq(N_t, N_g)
    if N_t % tq != 0:
        raise ValueError(f"tq={tq} must divide N_t={N_t}")
    Q = N_t // tq
    if tg is None:
        tg = _pick_tg(N_g)
    if N_g % tg != 0:
        raise ValueError(f"tg={tg} must divide N_g={N_g}")
    G = N_g // tg

    use_bf16_exp = _use_bf16_exp()
    vmem_limit = _vmem_limit_bytes()

    # ---- input pooling + layout ----
    rgb_p = _maxpool2_nchw(rgb)                                    # (B,C,H2,W2)
    rgb_flat = rgb_p.transpose(0, 2, 3, 1).reshape(B, N_t, C)
    rgb_flat = jnp.pad(rgb_flat, ((0, 0), (0, 0), (0, Cp - C))).astype(jnp.bfloat16)

    evt_p = _maxpool2_nchw(event)                                  # (B,C,H2,W2)
    e = evt_p.reshape(B, C, H4, 2, W4, 2).transpose(0, 3, 5, 2, 4, 1)
    evt_win = e.reshape(B, 4, N_g, C)                              # leading window axis
    evt_win = jnp.pad(evt_win, ((0, 0), (0, 0), (0, 0), (0, Cp - C))).astype(jnp.bfloat16)

    # ---- weights: pad, transpose for x @ W, cast to bf16; biases stay f32 ----
    def pad2(w, r, c):
        return jnp.pad(w, ((0, r - w.shape[0]), (0, c - w.shape[1])))

    def pad1(v, n):
        return jnp.pad(v, (0, n - v.shape[0])).reshape(1, n).astype(jnp.float32)

    wth = pad2(params["w_theta"], ICp, Cp).T.astype(jnp.bfloat16)  # (Cp, ICp)
    bth = pad1(params["b_theta"], ICp)

    # [phi | g] concatenated: one MXU RHS for both event-side 1x1 convs
    wpg = jnp.concatenate(
        [pad2(params["w_phi"], ICp, Cp).T, pad2(params["w_g"], ICp, Cp).T],
        axis=1).astype(jnp.bfloat16)                               # (Cp, 2*ICp)
    bpg = jnp.concatenate([pad1(params["b_phi"], ICp), pad1(params["b_g"], ICp)],
                          axis=1)                                  # (1, 2*ICp)

    # fold BatchNorm into the W projection (numerically identical)
    wW_f = params["w_W"] * params["bn_scale"][:, None]             # (C, IC)
    bW_f = params["b_W"] * params["bn_scale"] + params["bn_shift"]
    wW = pad2(wW_f, Cp, ICp).T.astype(jnp.bfloat16)                # (ICp, Cp)
    bW = pad1(bW_f, Cp)

    def full(a):
        return pl.BlockSpec(a.shape, lambda b, i: (0,) * a.ndim)

    # ---- pass 1: phi/g conv + 2x2 max-pool, streamed over N_g tiles ----
    phig = pl.pallas_call(
        phig_kernel,
        out_shape=jax.ShapeDtypeStruct((B, N_g, 2 * ICp), jnp.bfloat16),
        grid=(B, G),
        in_specs=[
            pl.BlockSpec((1, 4, tg, Cp), lambda b, g: (b, 0, g, 0)),
            full(wpg), full(bpg),
        ],
        out_specs=pl.BlockSpec((1, tg, 2 * ICp), lambda b, g: (b, g, 0)),
        compiler_params=pltpu.CompilerParams(
            dimension_semantics=("parallel", "parallel"),
            vmem_limit_bytes=vmem_limit,
        ),
    )(evt_win, wpg, bpg)

    # ---- pass 2: attention + W projection + residual ----
    out_flat = pl.pallas_call(
        functools.partial(ldam_kernel, use_bf16_exp=use_bf16_exp),
        out_shape=jax.ShapeDtypeStruct((B, N_t, Cp), jnp.bfloat16),
        grid=(B, Q),
        in_specs=[
            pl.BlockSpec((1, tq, Cp), lambda b, q: (b, q, 0)),          # rgb q-tile
            pl.BlockSpec((1, N_g, 2 * ICp), lambda b, q: (b, 0, 0)),    # [phi|g], per-batch
            full(wth), full(bth), full(wW), full(bW),
        ],
        out_specs=pl.BlockSpec((1, tq, Cp), lambda b, q: (b, q, 0)),
        compiler_params=pltpu.CompilerParams(
            dimension_semantics=("parallel", "parallel"),
            vmem_limit_bytes=vmem_limit,
        ),
    )(rgb_flat, phig, wth, bth, wW, bW)

    # back to NCHW at (H2, W2), nearest-neighbour 2x upsample, upcast to f32
    z = out_flat[:, :, :C].reshape(B, H2, W2, C).transpose(0, 3, 1, 2)
    z = jnp.broadcast_to(z[:, :, :, None, :, None],
                         (B, C, H2, 2, W2, 2)).reshape(B, C, H, W)
    return z.astype(jnp.float32)


# --------------------------------------------------------------------------
# Pure-JAX reference (mirrors the PyTorch forward) for correctness check
# --------------------------------------------------------------------------
def ldam_ref(rgb, event, params):
    B, C, H, W = rgb.shape
    IC = params["w_theta"].shape[0]

    def conv1x1(x, w, b):
        return jnp.einsum("bchw,oc->bohw", x, w) + b[None, :, None, None]

    rp = _maxpool2_nchw(rgb)
    ep = _maxpool2_nchw(event)

    g = _maxpool2_nchw(conv1x1(ep, params["w_g"], params["b_g"]))
    theta = conv1x1(rp, params["w_theta"], params["b_theta"])
    phi = _maxpool2_nchw(conv1x1(ep, params["w_phi"], params["b_phi"]))

    g_x = g.reshape(B, IC, -1).transpose(0, 2, 1)
    t_x = theta.reshape(B, IC, -1).transpose(0, 2, 1)
    p_x = phi.reshape(B, IC, -1)

    f = jax.nn.softmax(jnp.matmul(t_x, p_x), axis=-1)
    y = jnp.matmul(f, g_x).transpose(0, 2, 1).reshape(B, IC, rp.shape[2], rp.shape[3])

    Wy = conv1x1(y, params["w_W"], params["b_W"])
    Wy = (Wy * params["bn_scale"][None, :, None, None]
          + params["bn_shift"][None, :, None, None])
    z = Wy + rp
    return jnp.repeat(jnp.repeat(z, 2, axis=2), 2, axis=3)


def make_params(key, in_channels, scale=0.05):
    ic = max(in_channels // 2, 1)
    ks = jax.random.split(key, 10)
    return {
        "w_theta": scale * jax.random.normal(ks[0], (ic, in_channels), jnp.float32),
        "b_theta": scale * jax.random.normal(ks[1], (ic,), jnp.float32),
        "w_phi": scale * jax.random.normal(ks[2], (ic, in_channels), jnp.float32),
        "b_phi": scale * jax.random.normal(ks[3], (ic,), jnp.float32),
        "w_g": scale * jax.random.normal(ks[4], (ic, in_channels), jnp.float32),
        "b_g": scale * jax.random.normal(ks[5], (ic,), jnp.float32),
        "w_W": scale * jax.random.normal(ks[6], (in_channels, ic), jnp.float32),
        "b_W": scale * jax.random.normal(ks[7], (in_channels,), jnp.float32),
        # The PyTorch module initializes the trailing BatchNorm with gamma=0 /
        # beta=0 (zeroing the attention branch); use nonzero values so the
        # full compute path is exercised (semantics identical for any values).
        "bn_scale": 1.0 + 0.1 * jax.random.normal(ks[8], (in_channels,), jnp.float32),
        "bn_shift": 0.1 * jax.random.normal(ks[9], (in_channels,), jnp.float32),
    }


if __name__ == "__main__":
    def run_case(key, B, C, H, W, tq, tg, tol):
        k1, k2, k3 = jax.random.split(key, 3)
        rgb = jax.random.normal(k1, (B, C, H, W), jnp.float32)
        event = jax.random.normal(k2, (B, C, H, W), jnp.float32)
        params = make_params(k3, C)

        # compare at matched precision: feed bf16-representable inputs/weights
        # to both kernel and f32 reference (kernel uses bf16 MXU matmuls).
        qz = lambda x: x.astype(jnp.bfloat16).astype(jnp.float32)
        rgb_q, event_q = qz(rgb), qz(event)
        params_q = {k: (qz(v) if k.startswith("w_") else v) for k, v in params.items()}

        out = jax.block_until_ready(ldam_forward(rgb_q, event_q, params_q, tq=tq, tg=tg))
        ref = jax.block_until_ready(ldam_ref(rgb_q, event_q, params_q))

        assert out.shape == (B, C, H, W), out.shape
        err = float(jnp.max(jnp.abs(out - ref)))
        assert jnp.allclose(out, ref, atol=tol, rtol=tol), err

    key = jax.random.PRNGKey(0)
    k1, k2 = jax.random.split(key)
    # small shape: exercises channel padding (C=4 -> 128), q-tiling (Q=4) and
    # key-side tiling of the phi/g pass (G=2).
    run_case(k1, B=2, C=4, H=16, W=16, tq=16, tg=8, tol=3e-2)
    # lane-friendlier shape: C=64 -> Cp=128; auto tile selection.
    run_case(k2, B=1, C=64, H=32, W=32, tq=None, tg=None, tol=3e-2)
    print("KERNEL_OK")
</pallas_src>

<mosaic_0001>
module attributes {stable_mosaic.version = 11 : i64} {
  func.func @phig_kernel(%arg0: i32, %arg1: i32, %arg2: memref<1x4x8x128xbf16, #tpu.memory_space<vmem>>, %arg3: memref<128x256xbf16, #tpu.memory_space<vmem>>, %arg4: memref<1x256xf32, #tpu.memory_space<vmem>>, %arg5: memref<1x8x256xbf16, #tpu.memory_space<vmem>>) attributes {dimension_semantics = [#tpu.dimension_semantics<parallel>, #tpu.dimension_semantics<parallel>], iteration_bounds = array<i64: 2, 2>, scalar_prefetch = 0 : i64, scratch_operands = 0 : i64, tpu.core_type = #tpu.core_type<tc>, window_params = [{transform_indices = @transform_0, window_bounds = array<i64: 1, 4, 8, 128>}, {pipeline_mode = #tpu.pipeline_mode<synchronous>, transform_indices = @transform_1, window_bounds = array<i64: 128, 256>}, {pipeline_mode = #tpu.pipeline_mode<synchronous>, transform_indices = @transform_2, window_bounds = array<i64: 1, 256>}, {transform_indices = @transform_3, window_bounds = array<i64: 1, 8, 256>}]} {
    %c0 = arith.constant 0 : index
    %c0_0 = arith.constant 0 : index
    %0 = vector.load %arg3[%c0, %c0_0] : memref<128x256xbf16, #tpu.memory_space<vmem>>, vector<128x256xbf16>
    %c0_1 = arith.constant 0 : index
    %c0_2 = arith.constant 0 : index
    %c0_3 = arith.constant 0 : index
    %c0_4 = arith.constant 0 : index
    %1 = vector.load %arg2[%c0_1, %c0_2, %c0_3, %c0_4] : memref<1x4x8x128xbf16, #tpu.memory_space<vmem>>, vector<1x1x8x128xbf16>
    %2 = vector.shape_cast %1 : vector<1x1x8x128xbf16> to vector<8x128xbf16>
    %cst = arith.constant dense<0.000000e+00> : vector<8x256xf32>
    %3 = tpu.matmul %2, %0, %cst {dimension_numbers = #tpu.dot_dimension_numbers<[1], [0], [0], [1], [0, 0, 1, 1], [], []>} : vector<8x128xbf16>, vector<128x256xbf16>, vector<8x256xf32> -> vector<8x256xf32>
    %c0_5 = arith.constant 0 : index
    %c1 = arith.constant 1 : index
    %c0_6 = arith.constant 0 : index
    %c0_7 = arith.constant 0 : index
    %4 = vector.load %arg2[%c0_5, %c1, %c0_6, %c0_7] : memref<1x4x8x128xbf16, #tpu.memory_space<vmem>>, vector<1x1x8x128xbf16>
    %5 = vector.shape_cast %4 : vector<1x1x8x128xbf16> to vector<8x128xbf16>
    %cst_8 = arith.constant dense<0.000000e+00> : vector<8x256xf32>
    %6 = tpu.matmul %5, %0, %cst_8 {dimension_numbers = #tpu.dot_dimension_numbers<[1], [0], [0], [1], [0, 0, 1, 1], [], []>} : vector<8x128xbf16>, vector<128x256xbf16>, vector<8x256xf32> -> vector<8x256xf32>
    %7 = arith.maximumf %3, %6 : vector<8x256xf32>
    %c0_9 = arith.constant 0 : index
    %c2 = arith.constant 2 : index
    %c0_10 = arith.constant 0 : index
    %c0_11 = arith.constant 0 : index
    %8 = vector.load %arg2[%c0_9, %c2, %c0_10, %c0_11] : memref<1x4x8x128xbf16, #tpu.memory_space<vmem>>, vector<1x1x8x128xbf16>
    %9 = vector.shape_cast %8 : vector<1x1x8x128xbf16> to vector<8x128xbf16>
    %cst_12 = arith.constant dense<0.000000e+00> : vector<8x256xf32>
    %10 = tpu.matmul %9, %0, %cst_12 {dimension_numbers = #tpu.dot_dimension_numbers<[1], [0], [0], [1], [0, 0, 1, 1], [], []>} : vector<8x128xbf16>, vector<128x256xbf16>, vector<8x256xf32> -> vector<8x256xf32>
    %11 = arith.maximumf %7, %10 : vector<8x256xf32>
    %c0_13 = arith.constant 0 : index
    %c3 = arith.constant 3 : index
    %c0_14 = arith.constant 0 : index
    %c0_15 = arith.constant 0 : index
    %12 = vector.load %arg2[%c0_13, %c3, %c0_14, %c0_15] : memref<1x4x8x128xbf16, #tpu.memory_space<vmem>>, vector<1x1x8x128xbf16>
    %13 = vector.shape_cast %12 : vector<1x1x8x128xbf16> to vector<8x128xbf16>
    %cst_16 = arith.constant dense<0.000000e+00> : vector<8x256xf32>
    %14 = tpu.matmul %13, %0, %cst_16 {dimension_numbers = #tpu.dot_dimension_numbers<[1], [0], [0], [1], [0, 0, 1, 1], [], []>} : vector<8x128xbf16>, vector<128x256xbf16>, vector<8x256xf32> -> vector<8x256xf32>
    %15 = arith.maximumf %11, %14 : vector<8x256xf32>
    %c0_17 = arith.constant 0 : index
    %c0_18 = arith.constant 0 : index
    %16 = vector.load %arg4[%c0_17, %c0_18] : memref<1x256xf32, #tpu.memory_space<vmem>>, vector<1x256xf32>
    %17 = vector.broadcast %16 : vector<1x256xf32> to vector<8x256xf32>
    %18 = arith.addf %15, %17 : vector<8x256xf32>
    %19 = arith.truncf %18 : vector<8x256xf32> to vector<8x256xbf16>
    %c0_19 = arith.constant 0 : index
    %c0_20 = arith.constant 0 : index
    %c0_21 = arith.constant 0 : index
    %20 = vector.load %arg5[%c0_19, %c0_20, %c0_21] : memref<1x8x256xbf16, #tpu.memory_space<vmem>>, vector<1x8x256xbf16>
    %21 = vector.shape_cast %20 : vector<1x8x256xbf16> to vector<8x256xbf16>
    %22 = vector.shape_cast %19 : vector<8x256xbf16> to vector<1x8x256xbf16>
    tpu.vector_store %arg5[%c0_19, %c0_20, %c0_21], %22 {strides = array<i32>} : memref<1x8x256xbf16, #tpu.memory_space<vmem>>, vector<1x8x256xbf16>,
    return
  }
  func.func @transform_0(%arg0: i32, %arg1: i32) -> (i32, i32, i32, i32) {
    %c0_i32 = arith.constant 0 : i32
    %c0_i32_0 = arith.constant 0 : i32
    %c0_i32_1 = arith.constant 0 : i32
    return %arg0, %c0_i32, %arg1, %c0_i32_0 : i32, i32, i32, i32
  }
  func.func @transform_1(%arg0: i32, %arg1: i32) -> (i32, i32) {
    %c0_i32 = arith.constant 0 : i32
    %c0_i32_0 = arith.constant 0 : i32
    %c0_i32_1 = arith.constant 0 : i32
    return %c0_i32, %c0_i32_0 : i32, i32
  }
  func.func @transform_2(%arg0: i32, %arg1: i32) -> (i32, i32) {
    %c0_i32 = arith.constant 0 : i32
    %c0_i32_0 = arith.constant 0 : i32
    %c0_i32_1 = arith.constant 0 : i32
    return %c0_i32, %c0_i32_0 : i32, i32
  }
  func.func @transform_3(%arg0: i32, %arg1: i32) -> (i32, i32, i32) {
    %c0_i32 = arith.constant 0 : i32
    %c0_i32_0 = arith.constant 0 : i32
    return %arg0, %arg1, %c0_i32 : i32, i32, i32
  }
}

module attributes {stable_mosaic.version = 11 : i64} {
  func.func @ldam_kernel(%arg0: i32, %arg1: i32, %arg2: memref<1x16x128xbf16, #tpu.memory_space<vmem>>, %arg3: memref<1x16x256xbf16, #tpu.memory_space<vmem>>, %arg4: memref<128x128xbf16, #tpu.memory_space<vmem>>, %arg5: memref<1x128xf32, #tpu.memory_space<vmem>>, %arg6: memref<128x128xbf16, #tpu.memory_space<vmem>>, %arg7: memref<1x128xf32, #tpu.memory_space<vmem>>, %arg8: memref<1x16x128xbf16, #tpu.memory_space<vmem>>) attributes {dimension_semantics = [#tpu.dimension_semantics<parallel>, #tpu.dimension_semantics<parallel>], iteration_bounds = array<i64: 2, 4>, scalar_prefetch = 0 : i64, scratch_operands = 0 : i64, tpu.core_type = #tpu.core_type<tc>, window_params = [{transform_indices = @transform_0, window_bounds = array<i64: 1, 16, 128>}, {transform_indices = @transform_1, window_bounds = array<i64: 1, 16, 256>}, {pipeline_mode = #tpu.pipeline_mode<synchronous>, transform_indices = @transform_2, window_bounds = array<i64: 128, 128>}, {pipeline_mode = #tpu.pipeline_mode<synchronous>, transform_indices = @transform_3, window_bounds = array<i64: 1, 128>}, {pipeline_mode = #tpu.pipeline_mode<synchronous>, transform_indices = @transform_4, window_bounds = array<i64: 128, 128>}, {pipeline_mode = #tpu.pipeline_mode<synchronous>, transform_indices = @transform_5, window_bounds = array<i64: 1, 128>}, {transform_indices = @transform_6, window_bounds = array<i64: 1, 16, 128>}]} {
    %c0 = arith.constant 0 : index
    %c0_0 = arith.constant 0 : index
    %c0_1 = arith.constant 0 : index
    %0 = vector.load %arg2[%c0, %c0_0, %c0_1] : memref<1x16x128xbf16, #tpu.memory_space<vmem>>, vector<1x16x128xbf16>
    %1 = vector.shape_cast %0 : vector<1x16x128xbf16> to vector<16x128xbf16>
    %c0_2 = arith.constant 0 : index
    %c0_3 = arith.constant 0 : index
    %2 = vector.load %arg4[%c0_2, %c0_3] : memref<128x128xbf16, #tpu.memory_space<vmem>>, vector<128x128xbf16>
    %cst = arith.constant dense<0.000000e+00> : vector<16x128xf32>
    %3 = tpu.matmul %1, %2, %cst {dimension_numbers = #tpu.dot_dimension_numbers<[1], [0], [0], [1], [0, 0, 1, 1], [], []>} : vector<16x128xbf16>, vector<128x128xbf16>, vector<16x128xf32> -> vector<16x128xf32>
    %c0_4 = arith.constant 0 : index
    %c0_5 = arith.constant 0 : index
    %4 = vector.load %arg5[%c0_4, %c0_5] : memref<1x128xf32, #tpu.memory_space<vmem>>, vector<1x128xf32>
    %5 = vector.broadcast %4 : vector<1x128xf32> to vector<16x128xf32>
    %6 = arith.addf %3, %5 : vector<16x128xf32>
    %c0_6 = arith.constant 0 : index
    %c0_7 = arith.constant 0 : index
    %c0_8 = arith.constant 0 : index
    %7 = vector.load %arg3[%c0_6, %c0_7, %c0_8] : memref<1x16x256xbf16, #tpu.memory_space<vmem>>, vector<1x16x128xbf16>
    %8 = vector.shape_cast %7 : vector<1x16x128xbf16> to vector<16x128xbf16>
    %c0_9 = arith.constant 0 : index
    %c0_10 = arith.constant 0 : index
    %c128 = arith.constant 128 : index
    %9 = vector.load %arg3[%c0_9, %c0_10, %c128] : memref<1x16x256xbf16, #tpu.memory_space<vmem>>, vector<1x16x128xbf16>
    %10 = vector.shape_cast %9 : vector<1x16x128xbf16> to vector<16x128xbf16>
    %11 = arith.truncf %6 : vector<16x128xf32> to vector<16x128xbf16>
    %cst_11 = arith.constant dense<0.000000e+00> : vector<16x16xf32>
    %12 = tpu.matmul %11, %8, %cst_11 {dimension_numbers = #tpu.dot_dimension_numbers<[1], [1], [0], [0], [0, 0, 1, 0], [], []>} : vector<16x128xbf16>, vector<16x128xbf16>, vector<16x16xf32> -> vector<16x16xf32>
    %cst_12 = arith.constant dense<0xFF800000> : vector<16xf32>
    %13 = vector.multi_reduction <maximumf>, %12, %cst_12 [1] : vector<16x16xf32> to vector<16xf32>
    %14 = vector.shape_cast %13 : vector<16xf32> to vector<16x1xf32>
    %15 = vector.broadcast %14 : vector<16x1xf32> to vector<16x16xf32>
    %16 = arith.subf %12, %15 : vector<16x16xf32>
    %17 = math.exp %16 : vector<16x16xf32>
    %cst_13 = arith.constant dense<0.000000e+00> : vector<16xf32>
    %18 = vector.multi_reduction <add>, %17, %cst_13 [1] : vector<16x16xf32> to vector<16xf32>
    %19 = vector.shape_cast %18 : vector<16xf32> to vector<16x1xf32>
    %20 = arith.truncf %17 : vector<16x16xf32> to vector<16x16xbf16>
    %cst_14 = arith.constant dense<0.000000e+00> : vector<16x128xf32>
    %21 = tpu.matmul %20, %10, %cst_14 {dimension_numbers = #tpu.dot_dimension_numbers<[1], [0], [0], [1], [0, 0, 1, 1], [], []>} : vector<16x16xbf16>, vector<16x128xbf16>, vector<16x128xf32> -> vector<16x128xf32>
    %22 = tpu.reciprocal %19 {approx = true} : vector<16x1xf32> -> vector<16x1xf32>
    %23 = vector.broadcast %22 : vector<16x1xf32> to vector<16x128xf32>
    %24 = arith.mulf %21, %23 : vector<16x128xf32>
    %25 = arith.truncf %24 : vector<16x128xf32> to vector<16x128xbf16>
    %c0_15 = arith.constant 0 : index
    %c0_16 = arith.constant 0 : index
    %26 = vector.load %arg6[%c0_15, %c0_16] : memref<128x128xbf16, #tpu.memory_space<vmem>>, vector<128x128xbf16>
    %cst_17 = arith.constant dense<0.000000e+00> : vector<16x128xf32>
    %27 = tpu.matmul %25, %26, %cst_17 {dimension_numbers = #tpu.dot_dimension_numbers<[1], [0], [0], [1], [0, 0, 1, 1], [], []>} : vector<16x128xbf16>, vector<128x128xbf16>, vector<16x128xf32> -> vector<16x128xf32>
    %c0_18 = arith.constant 0 : index
    %c0_19 = arith.constant 0 : index
    %28 = vector.load %arg7[%c0_18, %c0_19] : memref<1x128xf32, #tpu.memory_space<vmem>>, vector<1x128xf32>
    %29 = vector.broadcast %28 : vector<1x128xf32> to vector<16x128xf32>
    %30 = arith.addf %27, %29 : vector<16x128xf32>
    %31 = arith.extf %1 : vector<16x128xbf16> to vector<16x128xf32>
    %32 = arith.addf %30, %31 : vector<16x128xf32>
    %33 = arith.truncf %32 : vector<16x128xf32> to vector<16x128xbf16>
    %c0_20 = arith.constant 0 : index
    %c0_21 = arith.constant 0 : index
    %c0_22 = arith.constant 0 : index
    %34 = vector.load %arg8[%c0_20, %c0_21, %c0_22] : memref<1x16x128xbf16, #tpu.memory_space<vmem>>, vector<1x16x128xbf16>
    %35 = vector.shape_cast %34 : vector<1x16x128xbf16> to vector<16x128xbf16>
    %36 = vector.shape_cast %33 : vector<16x128xbf16> to vector<1x16x128xbf16>
    tpu.vector_store %arg8[%c0_20, %c0_21, %c0_22], %36 {strides = array<i32>} : memref<1x16x128xbf16, #tpu.memory_space<vmem>>, vector<1x16x128xbf16>,
    return
  }
  func.func @transform_0(%arg0: i32, %arg1: i32) -> (i32, i32, i32) {
    %c0_i32 = arith.constant 0 : i32
    %c0_i32_0 = arith.constant 0 : i32
    return %arg0, %arg1, %c0_i32 : i32, i32, i32
  }
  func.func @transform_1(%arg0: i32, %arg1: i32) -> (i32, i32, i32) {
    %c0_i32 = arith.constant 0 : i32
    %c0_i32_0 = arith.constant 0 : i32
    %c0_i32_1 = arith.constant 0 : i32
    return %arg0, %c0_i32, %c0_i32_0 : i32, i32, i32
  }
  func.func @transform_2(%arg0: i32, %arg1: i32) -> (i32, i32) {
    %c0_i32 = arith.constant 0 : i32
    %c0_i32_0 = arith.constant 0 : i32
    %c0_i32_1 = arith.constant 0 : i32
    return %c0_i32, %c0_i32_0 : i32, i32
  }
  func.func @transform_3(%arg0: i32, %arg1: i32) -> (i32, i32) {
    %c0_i32 = arith.constant 0 : i32
    %c0_i32_0 = arith.constant 0 : i32
    %c0_i32_1 = arith.constant 0 : i32
    return %c0_i32, %c0_i32_0 : i32, i32
  }
  func.func @transform_4(%arg0: i32, %arg1: i32) -> (i32, i32) {
    %c0_i32 = arith.constant 0 : i32
    %c0_i32_0 = arith.constant 0 : i32
    %c0_i32_1 = arith.constant 0 : i32
    return %c0_i32, %c0_i32_0 : i32, i32
  }
  func.func @transform_5(%arg0: i32, %arg1: i32) -> (i32, i32) {
    %c0_i32 = arith.constant 0 : i32
    %c0_i32_0 = arith.constant 0 : i32
    %c0_i32_1 = arith.constant 0 : i32
    return %c0_i32, %c0_i32_0 : i32, i32
  }
  func.func @transform_6(%arg0: i32, %arg1: i32) -> (i32, i32, i32) {
    %c0_i32 = arith.constant 0 : i32
    %c0_i32_0 = arith.constant 0 : i32
    return %arg0, %arg1, %c0_i32 : i32, i32, i32
  }
}

</mosaic_0001>

<bundles_post_ra>
// kernel: ldam_forward.2
= control target key start
LH: loop header
LB: loop body
LE: loop exit
PB: predicated region body
PF: predicated region fallthrough
CT: control target
= control target key end

     0   :  { %s798_s12 = smov 0   ;;  %s800_s13 = smov 0   ;;  %s1048_s0 = inlined_call_operand.vmem [shape: bf16[2,4,16,128], index: 0, kind: input, shape index: {}]   ;;  %s1049_s1 = inlined_call_operand.vmem [shape: bf16[128,256], index: 1, kind: input, shape index: {}]   ;;  %s1050_s2 = inlined_call_operand.vmem [shape: f32[1,256], index: 2, kind: input, shape index: {}]   ;;  %s1051_s3 = inlined_call_operand.vmem [shape: bf16[2,16,256], index: 3, kind: output, shape index: {}]  }
   0x1   :  { %s802_s14 = smov 0   ;;  %s804_s15 = smov 0  }
   0x2   :  { %s806_s16 = smov 0   ;;  %s808_s17 = smov 0  }
   0x3   :  { %s810_s18 = smov 0  }
   0x4 LB: > { %s22_s19 = sadd.s32 1, %s768_s16  ;;  %s25_s20 = sadd.s32 1, %s772_s17  ;;  %s776_s18 = sphi %s810_s18, %s13_s18   ;;  %s772_s17 = sphi %s808_s17, %s1057_s17   ;;  %s768_s16 = sphi %s806_s16, %s1056_s16   ;;  %s764_s15 = sphi %s804_s15, %s1055_s15   ;;  %s760_s14 = sphi %s802_s14, %s1054_s14   ;;  %s756_s13 = sphi %s800_s13, %s1053_s13   ;;  %s752_s12 = sphi %s798_s12, %s1052_s12  }
   0x5   : > { %p23_p0 = scmp.ge.s32.totalorder %s22_s19, 2  ;;  %p41_p1 = scmp.ne.s32.totalorder %s756_s13, %s752_s12 }
   0x6   : > { %p42_p2 = scmp.eq.s32.totalorder %s776_s18, 0  ;;  %s34_s24 = sadd.s32 1, %s756_s13 }
   0x7   : > { %s1059_s19 = smov (%p23_p0, %s22_s19), 0  ;;  %s1061_s20 = smov (!%p23_p0, %s25_s20), %s772_s17 }
   0x8   : > { %p43_p3 = por %p42_p2, %p41_p1  ;;  %p27_p4 = scmp.ge.s32.totalorder %s1061_s20, 2 }
   0x9   : > { %s30_s21 = ssub.s32 %s768_s16, %s1059_s19  ;;  %p572_p6 = scmp.ge.s32.totalorder %s776_s18, 4 }
   0xa   : > { %s1063_s20 = smov (%p27_p4, %s1061_s20), 0 }
   0xb   : > { %s29_s22 = ssub.s32 %s772_s17, %s1063_s20  ;;  %143 = sbr.rel (%p572_p6) target bundleno = 26 (0x1a), region = 24 }
   0xc   : > { %s31_s23 = sor.u32 %s30_s21, %s29_s22 }
   0xd   : > { %p32_p5 = scmp.eq.s32.totalorder %s31_s23, 0 }
   0xf   : > { %s849_s25 = scalar_select %p32_p5, %s756_s13, %s34_s24  }
  0x10   : > { %146 = sbr.rel (!%p43_p3) target bundleno = 26 (0x1a), region = 28  ;;  %s148_s26 = sand.u32 (%p43_p3), 1, %s756_s13  }
  0x11   : > { %s574_s27 = sshll.u32 (%p43_p3), %s772_s17, 3  ;;  %s573_s28 = sshll.u32 (%p43_p3), %s148_s26, 4 }
  0x12   : > { %s152_s29 = sadd.s32 (%p43_p3), %s768_s16, %s574_s27  ;;  %s150_s7 = scalar_lea.vmem (%p43_p3), [#allocation2], %s573_s28 }
  0x13   : > { %s575_s30 = sshll.u32 (%p43_p3), %s152_s29, 2 }
  0x14   : > { %s154_s6 = scalar_lea.vmem (%p43_p3), %s1048_s0, %s575_s30 }
  0x15   : > { %v171_v0 = vld [vmem:[%s154_s6] sm:$0xf]  ;;  %v173_v1 = vld [vmem:[%s154_s6 + $0x8] sm:$0xf]  ;;  %v175_v2 = vld [vmem:[%s154_s6 + $0x10] sm:$0xf] }
  0x16   : > { %172 = vst [vmem:[%s150_s7] sm:$0xf] %v171_v0  ;;  %v177_v3 = vld [vmem:[%s154_s6 + $0x18] sm:$0xf] }
  0x17   : > { %174 = vst [vmem:[%s150_s7 + $0x4] sm:$0xf] %v173_v1 }
  0x18   : > { %176 = vst [vmem:[%s150_s7 + $0x8] sm:$0xf] %v175_v2 }
  0x19   : > { %178 = vst [vmem:[%s150_s7 + $0xc] sm:$0xf] %v177_v3 }
  0x1a PF: > { %p576_p7 = scmp.ge.s32.totalorder %s776_s18, 1  ;;  %p209_p8 = scmp.lt.s32.totalorder %s776_s18, 5 }
  0x1c   : > { %p210_p9 = pnand %p576_p7, %p209_p8 }
  0x1d   : > { %s216_s22 = sand.u32 (!%p210_p9), 1, %s752_s12   ;;  %p243_p10 = scmp.lt.s32.totalorder (!%p210_p9), %s764_s15, 1 }
  0x1e   : > { %213 = sbr.rel (%p210_p9) target bundleno = 242 (0xf2), region = 69  ;;  %s577_s12 = sshll.u32 (!%p210_p9), %s216_s22, 4 }
  0x1f   : > { %s993_s5 = scalar_lea.vmem (!%p210_p9), [#allocation2], %s577_s12  ;;  %p245_p11 = scmp.lt.s32.totalorder (!%p210_p9), %s760_s14, 1 }
  0x23   : > { %v639_v4 = vld [vmem:[%s1049_s1 + $0x70] sm:$0xf]  ;;  %v665_v5 = vld [vmem:[%s1049_s1 + $0x74] sm:$0xf0]  ;;  %v664_v6 = vld [vmem:[%s1049_s1 + $0x74] sm:$0xf] }
  0x24   : > { %v869_v7 = vor.u32 %v665_v5, %v639_v4  ;;  %v641_v8 = vld [vmem:[%s1049_s1 + $0x78] sm:$0xf0]  ;;  %v631_v9 = vld [vmem:[%s1049_s1 + $0x60] sm:$0xf]  ;;  %v663_v10 = vld [vmem:[%s1049_s1 + $0x64] sm:$0xf0] }
  0x25   : > { %v880_v11 = vor.u32 %v664_v6, %v641_v8  ;;  %v662_v12 = vld [vmem:[%s1049_s1 + $0x64] sm:$0xf]  ;;  %v633_v13 = vld [vmem:[%s1049_s1 + $0x68] sm:$0xf0]  ;;  %v890_v14 = vor.u32 %v663_v10, %v631_v9  ;;  %v623_v16 = vld [vmem:[%s1049_s1 + $0x50] sm:$0xf] }
  0x26   : > { %349 = vmatpush.bf16.msra.mxu0 %v869_v7  ;;  %377 = vmatpush.bf16.msra.mxu2 %v869_v7  ;;  %v894_v15 = vor.u32 %v662_v12, %v633_v13  ;;  %v661_v17 = vld [vmem:[%s1049_s1 + $0x54] sm:$0xf0]  ;;  %v660_v18 = vld [vmem:[%s1049_s1 + $0x54] sm:$0xf]  ;;  %v625_v19 = vld [vmem:[%s1049_s1 + $0x58] sm:$0xf0] }
  0x27   : > { %362 = vmatpush.bf16.msra.mxu1 %v880_v11  ;;  %390 = vmatpush.bf16.msra.mxu3 %v880_v11  ;;  %v910_v20 = vor.u32 %v661_v17, %v623_v16  ;;  %v914_v21 = vor.u32 %v660_v18, %v625_v19  ;;  %v615_v22 = vld [vmem:[%s1049_s1 + $0x40] sm:$0xf]  ;;  %v659_v23 = vld [vmem:[%s1049_s1 + $0x44] sm:$0xf0]  ;;  %v658_v24 = vld [vmem:[%s1049_s1 + $0x44] sm:$0xf] }
  0x28   : > { %v617_v25 = vld [vmem:[%s1049_s1 + $0x48] sm:$0xf0]  ;;  %v930_v26 = vor.u32 %v659_v23, %v615_v22  ;;  %v607_v28 = vld [vmem:[%s1049_s1 + $0x30] sm:$0xf]  ;;  %v657_v29 = vld [vmem:[%s1049_s1 + $0x34] sm:$0xf0] }
  0x29   : > { %v934_v27 = vor.u32 %v658_v24, %v617_v25  ;;  %v656_v30 = vld [vmem:[%s1049_s1 + $0x34] sm:$0xf]  ;;  %v609_v31 = vld [vmem:[%s1049_s1 + $0x38] sm:$0xf0]  ;;  %v950_v32 = vor.u32 %v657_v29, %v607_v28  ;;  %v599_v34 = vld [vmem:[%s1049_s1 + $0x20] sm:$0xf] }
  0x2a   : > { %350 = vmatpush.bf16.msra.mxu0 %v890_v14  ;;  %378 = vmatpush.bf16.msra.mxu2 %v890_v14  ;;  %v612_v33 = vor.u32 %v656_v30, %v609_v31  ;;  %v655_v35 = vld [vmem:[%s1049_s1 + $0x24] sm:$0xf0]  ;;  %v654_v36 = vld [vmem:[%s1049_s1 + $0x24] sm:$0xf]  ;;  %v601_v37 = vld [vmem:[%s1049_s1 + $0x28] sm:$0xf0] }
  0x2b   : > { %363 = vmatpush.bf16.msra.mxu1 %v894_v15  ;;  %391 = vmatpush.bf16.msra.mxu3 %v894_v15  ;;  %v600_v38 = vor.u32 %v655_v35, %v599_v34  ;;  %v604_v39 = vor.u32 %v654_v36, %v601_v37  ;;  %v591_v40 = vld [vmem:[%s1049_s1 + $0x10] sm:$0xf]  ;;  %v653_v41 = vld [vmem:[%s1049_s1 + $0x14] sm:$0xf0]  ;;  %v652_v42 = vld [vmem:[%s1049_s1 + $0x14] sm:$0xf] }
  0x2c   : > { %v593_v43 = vld [vmem:[%s1049_s1 + $0x18] sm:$0xf0]  ;;  %v592_v44 = vor.u32 %v653_v41, %v591_v40  ;;  %v583_v46 = vld [vmem:[%s1049_s1] sm:$0xf]  ;;  %v651_v47 = vld [vmem:[%s1049_s1 + $0x4] sm:$0xf0] }
  0x2d   : > { %v596_v45 = vor.u32 %v652_v42, %v593_v43  ;;  %v650_v48 = vld [vmem:[%s1049_s1 + $0x4] sm:$0xf]  ;;  %v585_v49 = vld [vmem:[%s1049_s1 + $0x8] sm:$0xf0]  ;;  %v584_v50 = vor.u32 %v651_v47, %v583_v46  ;;  %v268_v53 = vld [vmem:[%s993_s5] sm:$0xf] }
  0x2e   : > { %351 = vmatpush.bf16.msra.mxu0 %v910_v20  ;;  %379 = vmatpush.bf16.msra.mxu2 %v910_v20  ;;  %v588_v51 = vor.u32 %v650_v48, %v585_v49  ;;  %v645_v52 = vld [vmem:[%s993_s5 + $0x4] sm:$0xf]  ;;  %v646_v54 = vld [vmem:[%s993_s5 + $0x8] sm:$0xf]  ;;  %v647_v55 = vld [vmem:[%s993_s5 + $0xc] sm:$0xf] }
  0x2f   : > { %364 = vmatpush.bf16.msra.mxu1 %v914_v21  ;;  %392 = vmatpush.bf16.msra.mxu3 %v914_v21  ;;  %s1065_s15 = smov (!%p243_p10, %s764_s15), 1  ;;  %s1067_s14 = smov (!%p245_p11, %s760_s14), 1  ;;  %v465_v2 = vld [vmem:[%s1050_s2] sm:$0x3] }
  0x30   : > { %s578_s6 = sshll.u32 %s1067_s14, 1  ;;  %s579_s7 = sshll.u32 %s1065_s15, 2  ;;  %v468_v8 = vperm.slane %v465_v2, 1 }
  0x31   : > { %s249_s10 = sadd.s32 %s579_s7, %s578_s6 }
  0x32   : > { %352 = vmatpush.bf16.msra.mxu0 %v930_v26  ;;  %380 = vmatpush.bf16.msra.mxu2 %v930_v26  ;;  %s580_s11 = sshll.u32 %s249_s10, 2 }
  0x33   : > { %365 = vmatpush.bf16.msra.mxu1 %v934_v27  ;;  %393 = vmatpush.bf16.msra.mxu3 %v934_v27  ;;  %s251_s21 = scalar_lea.vmem %s1051_s3, %s580_s11 }
  0x36   : > { %353 = vmatpush.bf16.msra.mxu0 %v950_v32  ;;  %381 = vmatpush.bf16.msra.mxu2 %v950_v32 }
  0x37   : > { %366 = vmatpush.bf16.msra.mxu1 %v612_v33  ;;  %394 = vmatpush.bf16.msra.mxu3 %v612_v33 }
  0x3a   : > { %354 = vmatpush.bf16.msra.mxu0 %v600_v38  ;;  %382 = vmatpush.bf16.msra.mxu2 %v600_v38 }
  0x3b   : > { %367 = vmatpush.bf16.msra.mxu1 %v604_v39  ;;  %395 = vmatpush.bf16.msra.mxu3 %v604_v39 }
  0x3e   : > { %355 = vmatpush.bf16.msra.mxu0 %v592_v44  ;;  %383 = vmatpush.bf16.msra.mxu2 %v592_v44 }
  0x3f   : > { %368 = vmatpush.bf16.msra.mxu1 %v596_v45  ;;  %396 = vmatpush.bf16.msra.mxu3 %v596_v45 }
  0x42   : > { %356 = vmatpush.bf16.msra.mxu0 %v584_v50  ;;  %384 = vmatpush.bf16.msra.mxu2 %v584_v50 }
  0x43   : > { %369 = vmatpush.bf16.msra.mxu1 %v588_v51  ;;  %397 = vmatpush.bf16.msra.mxu3 %v588_v51 }
  0x45   : > { %385 = vmatmul.bf16.vlgmr.msra.gmra.mxu2 %v645_v52  ;;  %357 = vmatmul.bf16.vlgmr.msra.gmra.mxu0 %v268_v53 }
  0x46   : > { %407 = vmatpush.bf16.msrb.mxu0 %v869_v7  ;;  %437 = vmatpush.bf16.msrb.mxu2 %v869_v7  ;;  %v467_v7 = vperm.slane %v465_v2, 0 }
  0x47   : > { %420 = vmatpush.bf16.msrb.mxu1 %v880_v11  ;;  %450 = vmatpush.bf16.msrb.mxu3 %v880_v11 }
  0x48   : > { %398 = vmatmul.bf16.vlgmr.msra.gmra.mxu3 %v645_v52  ;;  %370 = vmatmul.bf16.vlgmr.msra.gmra.mxu1 %v268_v53 }
  0x4a   : > { %408 = vmatpush.bf16.msrb.mxu0 %v890_v14  ;;  %438 = vmatpush.bf16.msrb.mxu2 %v890_v14 }
  0x4b   : > { %421 = vmatpush.bf16.msrb.mxu1 %v894_v15  ;;  %451 = vmatpush.bf16.msrb.mxu3 %v894_v15 }
  0x4e   : > { %409 = vmatpush.bf16.msrb.mxu0 %v910_v20  ;;  %439 = vmatpush.bf16.msrb.mxu2 %v910_v20 }
  0x4f   : > { %422 = vmatpush.bf16.msrb.mxu1 %v914_v21  ;;  %452 = vmatpush.bf16.msrb.mxu3 %v914_v21 }
  0x52   : > { %410 = vmatpush.bf16.msrb.mxu0 %v930_v26  ;;  %440 = vmatpush.bf16.msrb.mxu2 %v930_v26 }
  0x53   : > { %423 = vmatpush.bf16.msrb.mxu1 %v934_v27  ;;  %453 = vmatpush.bf16.msrb.mxu3 %v934_v27 }
  0x56   : > { %411 = vmatpush.bf16.msrb.mxu0 %v950_v32  ;;  %441 = vmatpush.bf16.msrb.mxu2 %v950_v32 }
  0x57   : > { %424 = vmatpush.bf16.msrb.mxu1 %v612_v33  ;;  %454 = vmatpush.bf16.msrb.mxu3 %v612_v33 }
  0x5a   : > { %412 = vmatpush.bf16.msrb.mxu0 %v600_v38  ;;  %442 = vmatpush.bf16.msrb.mxu2 %v600_v38 }
  0x5b   : > { %425 = vmatpush.bf16.msrb.mxu1 %v604_v39  ;;  %455 = vmatpush.bf16.msrb.mxu3 %v604_v39 }
  0x5e   : > { %413 = vmatpush.bf16.msrb.mxu0 %v592_v44  ;;  %443 = vmatpush.bf16.msrb.mxu2 %v592_v44 }
  0x5f   : > { %426 = vmatpush.bf16.msrb.mxu1 %v596_v45  ;;  %456 = vmatpush.bf16.msrb.mxu3 %v596_v45 }
  0x62   : > { %414 = vmatpush.bf16.msrb.mxu0 %v584_v50  ;;  %444 = vmatpush.bf16.msrb.mxu2 %v584_v50 }
  0x63   : > { %427 = vmatpush.bf16.msrb.mxu1 %v588_v51  ;;  %457 = vmatpush.bf16.msrb.mxu3 %v588_v51 }
  0x65   : > { %415 = vmatmul.bf16.vlgmr.msrb.gmra.mxu0 %v646_v54  ;;  %445 = vmatmul.bf16.vlgmr.msrb.gmra.mxu2 %v647_v55 }
  0x66   : > { %428 = vmatmul.bf16.vlgmr.msrb.gmra.mxu1 %v646_v54  ;;  %458 = vmatmul.bf16.vlgmr.msrb.gmra.mxu3 %v647_v55 }
  0xc2   : > { %v358_v56 = vpop.f32.mrf.mxu0 }
  0xc5   : > { %v371_v57 = vpop.f32.mrf.mxu1 }
  0xc8   : > { %v386_v58 = vpop.f32.mrf.mxu2 }
  0xc9   : > { %v403_v3 = vmax.f32 %v358_v56, %v386_v58 }
  0xca   : > { %v360_v60 = vpop.f32.mrf.mxu0 }
  0xcb   : > { %v399_v59 = vpop.f32.mrf.mxu3 }
  0xcc   : > { %v404_v4 = vmax.f32 %v371_v57, %v399_v59 }
  0xcd   : > { %v373_v61 = vpop.f32.mrf.mxu1 }
  0xd0   : > { %v388_v62 = vpop.f32.mrf.mxu2 }
  0xd3   : > { %v401_v63 = vpop.f32.mrf.mxu3 }
  0xe2   : > { %v416_v0 = vpop.f32.mrf.mxu0 }
  0xe3   : > { %v429_v1 = vpop.f32.mrf.mxu1  ;;  %v433_v5 = vmax.f32 %v403_v3, %v416_v0 }
  0xe4   : > { %v434_v6 = vmax.f32 %v404_v4, %v429_v1 }
  0xe8   : > { %v446_v9 = vpop.f32.mrf.mxu2 }
  0xe9   : > { %v459_v10 = vpop.f32.mrf.mxu3  ;;  %v463_v11 = vmax.f32 %v433_v5, %v446_v9 }
  0xea   : > { %v464_v12 = vmax.f32 %v434_v6, %v459_v10  ;;  %v418_v13 = vpop.f32.mrf.mxu0 }
  0xeb   : > { %v431_v14 = vpop.f32.mrf.mxu1  ;;  %v471_v15 = vadd.f32 %v467_v7, %v463_v11 }
  0xec   : > { %v472_v16 = vadd.f32 %v468_v8, %v464_v12 }
  0xee   : > { %v473_v17 = vpack.c.bf16 %v472_v16, %v471_v15 }
  0xf0   : > { %474 = vst [vmem:[%s251_s21] sm:$0xff] %v473_v17  ;;  %v448_v18 = vpop.f32.mrf.mxu2 }
  0xf1   : > { %v461_v19 = vpop.f32.mrf.mxu3 }
  0xf2 PF: > { %s13_s18 = sadd.s32 1, %s776_s18   ;;  %s1052_s12 = smov %s756_s13 }
  0xf3   : > { %p10_p12 = scmp.ge.s32.totalorder %s13_s18, 6   ;;  %s1053_s13 = smov %s849_s25 }
  0xf4   : > { %s1054_s14 = smov %s768_s16  ;;  %s1055_s15 = smov %s772_s17 }
  0xf5   : > { %s1056_s16 = smov %s1059_s19  ;;  %s1057_s17 = smov %s1063_s20 }
  0xf6   :  { %12 = sbr.rel (!%p10_p12) target bundleno = 4 (0x4), region = 111 }

// kernel: ldam_forward.3
= control target key start
LH: loop header
LB: loop body
LE: loop exit
PB: predicated region body
PF: predicated region fallthrough
CT: control target
= control target key end

     0   :  { %s909_s21 = smov 0   ;;  %s911_s22 = smov 0   ;;  %s1036_s0 = inlined_call_operand.vmem [shape: bf16[2,64,128], index: 0, kind: input, shape index: {}]   ;;  %s1037_s1 = inlined_call_operand.vmem [shape: bf16[2,16,256], index: 1, kind: input, shape index: {}]   ;;  %s1038_s2 = inlined_call_operand.vmem [shape: bf16[128,128], index: 2, kind: input, shape index: {}]   ;;  %s1039_s3 = inlined_call_operand.vmem [shape: f32[1,128], index: 3, kind: input, shape index: {}]   ;;  %s1040_s4 = inlined_call_operand.vmem [shape: bf16[128,128], index: 4, kind: input, shape index: {}]   ;;  %s1041_s5 = inlined_call_operand.vmem [shape: f32[1,128], index: 5, kind: input, shape index: {}]   ;;  %s1042_s6 = inlined_call_operand.vmem [shape: bf16[2,64,128], index: 6, kind: output, shape index: {}]  }
   0x1   :  { %s913_s23 = smov 0   ;;  %s915_s24 = smov 0  }
   0x2   :  { %s917_s25 = smov 0  }
   0x3 LB: > { %s25_s26 = sadd.s32 1, %s864_s23  ;;  %s28_s27 = sadd.s32 1, %s868_s24  ;;  %s872_s25 = sphi %s917_s25, %s16_s25   ;;  %s868_s24 = sphi %s915_s24, %s1046_s24   ;;  %s864_s23 = sphi %s913_s23, %s1045_s23   ;;  %s860_s22 = sphi %s911_s22, %s1044_s22   ;;  %s856_s21 = sphi %s909_s21, %s1043_s21  }
   0x4   : > { %p26_p0 = scmp.ge.s32.totalorder %s25_s26, 4  ;;  %p671_p1 = scmp.ge.s32.totalorder %s872_s25, 1 }
   0x5   : > { %p243_p2 = scmp.lt.s32.totalorder %s872_s25, 9 }
   0x6   : > { %s1048_s26 = smov (%p26_p0, %s25_s26), 0  ;;  %s1050_s27 = smov (!%p26_p0, %s28_s27), %s868_s24 }
   0x7   : > { %p244_p3 = pnand %p671_p1, %p243_p2  ;;  %p30_p4 = scmp.ge.s32.totalorder %s1050_s27, 2 }
   0x8   : > { %s672_s10 = sshll.u32 (!%p244_p3), %s856_s21, 1  ;;  %p287_p5 = scmp.lt.s32.totalorder (!%p244_p3), %s860_s22, 1 }
   0x9   : > { %s1052_s27 = smov (%p30_p4, %s1050_s27), 0  ;;  %247 = sbr.rel (%p244_p3) target bundleno = 739 (0x2e3), region = 44 }
   0xa   : > { %p289_p6 = scmp.lt.s32.totalorder (!%p244_p3), %s672_s10, 7 }
   0xe   : > { %v768_v0 = vld [vmem:[%s1038_s2 + $0x38] sm:$0xff]  ;;  %v767_v1 = vld [vmem:[%s1038_s2 + $0x30] sm:$0xff]  ;;  %v766_v2 = vld [vmem:[%s1038_s2 + $0x28] sm:$0xff]  ;;  %s1054_s22 = smov (!%p287_p5, %s860_s22), 1  ;;  %s1056_s10 = smov (!%p289_p6, %s672_s10), 7  ;;  %vm427_vm0 = vcmask 130048  }
   0xf   : > { %388 = vmatpush.bf16.msra.mxu0 %v768_v0  ;;  %v765_v3 = vld [vmem:[%s1038_s2 + $0x20] sm:$0xff]  ;;  %v764_v4 = vld [vmem:[%s1038_s2 + $0x18] sm:$0xff]  ;;  %s673_s15 = sshll.u32 %s1054_s22, 3  ;;  %v763_v5 = vld [vmem:[%s1038_s2 + $0x10] sm:$0xff]  ;;  %s759_s9 = sshll.u32 %s1054_s22, 4 }
  0x10   : > { %s960_s18 = sadd.s32 %s673_s15, %s1056_s10  ;;  %v762_v6 = vld [vmem:[%s1038_s2 + $0x8] sm:$0xff]  ;;  %v761_v7 = vld [vmem:[%s1038_s2] sm:$0xff]  ;;  %s300_s12 = scalar_lea.vmem %s1037_s1, %s759_s9  ;;  %v778_v36 = vld [vmem:[%s1040_s4 + $0x38] sm:$0xff] }
  0x11   : > { %s674_s21 = sshll.u32 %s960_s18, 2  ;;  %v718_v9 = vld [vmem:[%s300_s12] sm:$0xf]  ;;  %v769_v10 = vld [vmem:[%s300_s12 + $0x4] sm:$0xf0]  ;;  %543 = vmatpush.bf16.msra.mxu3 %v778_v36  ;;  %v777_v37 = vld [vmem:[%s1040_s4 + $0x30] sm:$0xff] }
  0x12   : > { %s974_s8 = scalar_lea.vmem %s1036_s0, %s674_s21  ;;  %v719_v11 = vor.u32 %v769_v10, %v718_v9  ;;  %v824_v13 = vld [vmem:[%s1039_s3] ss:$0 sm:$0xff]  ;;  %v722_v22 = vld [vmem:[%s300_s12 + $0x4] sm:$0xf]  ;;  %v770_v23 = vld [vmem:[%s300_s12 + $0x8] sm:$0xf0]  ;;  %s309_s19 = scalar_lea.vmem %s1042_s6, %s674_s21 }
  0x13   : > { %389 = vmatpush.bf16.msra.mxu0 %v767_v1  ;;  %v760_v8 = vld [vmem:[%s974_s8] sm:$0xff]  ;;  %v723_v24 = vor.u32 %v770_v23, %v722_v22  ;;  %v776_v38 = vld [vmem:[%s1040_s4 + $0x28] sm:$0xff]  ;;  %v774_v40 = vld [vmem:[%s1040_s4 + $0x18] sm:$0xff] }
  0x14   : > { %420 = vmatpush.bf16.xpose.msra.mxu1 %v719_v11  ;;  %v775_v39 = vld [vmem:[%s1040_s4 + $0x20] sm:$0xff]  ;;  %v773_v41 = vld [vmem:[%s1040_s4 + $0x10] sm:$0xff]  ;;  %v772_v42 = vld [vmem:[%s1040_s4 + $0x8] sm:$0xff] }
  0x15   : > { %463 = vmatpush.bf16.msra.mxu2 %v723_v24  ;;  %544 = vmatpush.bf16.msra.mxu3 %v777_v37  ;;  %v771_v43 = vld [vmem:[%s1040_s4] sm:$0xff] }
  0x16   : > { %v825_v54 = vld [vmem:[%s1041_s5] ss:$0 sm:$0xff] }
  0x17   : > { %390 = vmatpush.bf16.msra.mxu0 %v766_v2  ;;  %v312_v55 = vld [vmem:[%s974_s8] sm:$0xff]  }
  0x18   : > { %v557_v57 = vunpack.c.l.bf16 %v312_v55  ;;  %v558_v58 = vunpack.c.h.bf16 %v312_v55 }
  0x19   : > { %545 = vmatpush.bf16.msra.mxu3 %v776_v38 }
  0x1b   : > { %391 = vmatpush.bf16.msra.mxu0 %v765_v3 }
  0x1d   : > { %546 = vmatpush.bf16.msra.mxu3 %v775_v39 }
  0x1f   : > { %392 = vmatpush.bf16.msra.mxu0 %v764_v4 }
  0x21   : > { %547 = vmatpush.bf16.msra.mxu3 %v774_v40 }
  0x23   : > { %393 = vmatpush.bf16.msra.mxu0 %v763_v5 }
  0x25   : > { %548 = vmatpush.bf16.msra.mxu3 %v773_v41 }
  0x27   : > { %394 = vmatpush.bf16.msra.mxu0 %v762_v6 }
  0x29   : > { %549 = vmatpush.bf16.msra.mxu3 %v772_v42 }
  0x2b   : > { %395 = vmatpush.bf16.msra.mxu0 %v761_v7 }
  0x2d   : > { %550 = vmatpush.bf16.msra.mxu3 %v771_v43 }
  0x2e   : > { %396 = vmatmul.bf16.vlgmr.msra.gmra.mxu0 %v760_v8 }
  0xab   : > { %v397_v12 = vpop.f32.mrf.mxu0 }
  0xac   : > { %v398_v15 = vadd.f32 %v824_v13, %v397_v12 }
  0xb3   : > { %v399_v14 = vpop.f32.mrf.mxu0 }
  0xb4   : > { %v400_v16 = vadd.f32 %v824_v13, %v399_v14 }
  0xb6   : > { %v406_v17 = vpack.c.bf16 %v400_v16, %v398_v15 }
  0xb8   : > { %421 = vmatmul.bf16.vlgmr.msra.gmra.mxu1 %v406_v17 }
 0x135   : > { %v422_v18 = vpop.f32.mrf.mxu1 }
 0x136   : > { %v428_v19 = vsel %vm427_vm0, %v422_v18, -inf }
 0x137   : > { %429 = vmax.xlane.f32.xlu0 %v428_v19 }
 0x13d   : > { %v424_v20 = vpop.f32.mrf.mxu1 }
 0x13e   : > { %v431_v21 = vsel %vm427_vm0, %v424_v20, -inf }
 0x13f   : > { %432 = vmax.xlane.f32.xlu0 %v431_v21 }
 0x1aa   : > { %v430_v25 = vpop.xlane.xlu0 %429 }
 0x1ab   : > { %v434_v26 = vsub.f32 %v422_v18, %v430_v25 }
 0x1ad   : > { %v436_v27 = vmul.f32 1.442695, %v434_v26 }
 0x1af   : > { %826 = vpow2.f32 %v436_v27 }
 0x1b2   : > { %v433_v28 = vpop.xlane.xlu0 %432 }
 0x1b3   : > { %v435_v29 = vsub.f32 %v424_v20, %v433_v28 }
 0x1b5   : > { %v827_v30 = vpop.eup %826  ;;  %v438_v31 = vmul.f32 1.442695, %v435_v29 }
 0x1b6   : > { %v440_v32 = vsel %vm427_vm0, %v827_v30, 0.0 }
 0x1b7   : > { %828 = vpow2.f32 %v438_v31  ;;  %441 = vadd.xlane.f32.xlu1 %v440_v32 }
 0x1bd   : > { %v829_v33 = vpop.eup %828 }
 0x1be   : > { %v443_v34 = vsel %vm427_vm0, %v829_v33, 0.0  ;;  %v446_v35 = vpack.c.bf16 %v829_v33, %v827_v30 }
 0x1bf   : > { %444 = vadd.xlane.f32.xlu1 %v443_v34 }
 0x1c0   : > { %724 = vmatmul.msk.bf16.vlgmr.msra.gmra.mxu2 %vm427_vm0, %v446_v35 }
 0x22a   : > { %v442_v44 = vpop.xlane.xlu1 %441 }
 0x22b   : > { %830 = vrcp.f32 %v442_v44 }
 0x231   : > { %v831_v47 = vpop.eup %830 }
 0x232   : > { %v445_v45 = vpop.xlane.xlu1 %444 }
 0x233   : > { %832 = vrcp.f32 %v445_v45 }
 0x239   : > { %v833_v48 = vpop.eup %832 }
 0x243   : > { %v465_v46 = vpop.f32.mrf.mxu2 }
 0x244   : > { %v472_v50 = vmul.f32 %v831_v47, %v465_v46 }
 0x24b   : > { %v467_v49 = vpop.f32.mrf.mxu2 }
 0x24c   : > { %v473_v51 = vmul.f32 %v833_v48, %v467_v49 }
 0x24e   : > { %v474_v52 = vpack.c.bf16 %v473_v51, %v472_v50 }
 0x250   : > { %551 = vmatmul.bf16.vlgmr.msra.gmra.mxu3 %v474_v52 }
 0x2d3   : > { %v552_v53 = vpop.f32.mrf.mxu3 }
 0x2d4   : > { %v553_v56 = vadd.f32 %v825_v54, %v552_v53 }
 0x2d6   : > { %v559_v61 = vadd.f32 %v557_v57, %v553_v56 }
 0x2db   : > { %v554_v59 = vpop.f32.mrf.mxu3 }
 0x2dc   : > { %v555_v60 = vadd.f32 %v825_v54, %v554_v59 }
 0x2de   : > { %v560_v62 = vadd.f32 %v558_v58, %v555_v60 }
 0x2e0   : > { %v782_v63 = vpack.c.bf16 %v560_v62, %v559_v61 }
 0x2e2   : > { %783 = vst [vmem:[%s309_s19] sm:$0xff] %v782_v63  }
 0x2e3 PF: > { %s16_s25 = sadd.s32 1, %s872_s25   ;;  %s1043_s21 = smov %s864_s23 }
 0x2e4   : > { %p13_p7 = scmp.ge.s32.totalorder %s16_s25, 10   ;;  %s1044_s22 = smov %s868_s24 }
 0x2e5   : > { %s1045_s23 = smov %s1048_s26  ;;  %s1046_s24 = smov %s1052_s27 }
 0x2e6   :  { %15 = sbr.rel (!%p13_p7) target bundleno = 3 (0x3), region = 77 }

</bundles_post_ra>
